<compile_context>
chip_gen: v7x
topology: tpu7x:2x2x1
jax: 0.10.0
libtpu: 0.0.40
codegen_flags: <defaults>
</compile_context>

<pallas_src>
import functools
import numpy as np
import jax
import jax.numpy as jnp
from jax import lax
from jax.experimental import pallas as pl
from jax.experimental.pallas import tpu as pltpu

EPS_GEN = 1e-7       # GENConv message epsilon
EPS_BN = 1e-5        # BatchNorm epsilon
EPS_SOFTMAX = 1e-16  # pyg softmax denominator epsilon
LANE = 128
ROW_TILE_CAP = 256   # row tile cap (safe for v7x's 64 MiB VMEM as well)


def _round_up(x, m):
    return ((x + m - 1) // m) * m


def _pad_rows(m, cap=ROW_TILE_CAP):
    """Return (padded_rows, row_tile) with padded_rows % row_tile == 0."""
    m8 = _round_up(max(m, 1), 8)
    if m8 <= cap:
        return m8, m8
    return _round_up(m, cap), cap


# ----------------------------- Pallas kernels -------------------------------

def _stats_update(y, sum_ref, sq_ref, stats_ref, m_real, tile_m):
    """Accumulate masked per-channel sum / sum-sq across the row grid and
    finalize (mean, biased var) into stats_ref on the last grid step."""
    i = pl.program_id(0)

    @pl.when(i == 0)
    def _():
        sum_ref[...] = jnp.zeros_like(sum_ref)
        sq_ref[...] = jnp.zeros_like(sq_ref)

    rows = i * tile_m + lax.broadcasted_iota(jnp.int32, y.shape, 0)
    rmask = (rows < m_real).astype(jnp.float32)
    ym = y * rmask
    sum_ref[...] += jnp.sum(ym, axis=0, keepdims=True)
    sq_ref[...] += jnp.sum(ym * y, axis=0, keepdims=True)

    @pl.when(i == pl.num_programs(0) - 1)
    def _():
        inv_m = 1.0 / float(m_real)
        mean = sum_ref[...] * inv_m
        var = jnp.maximum(sq_ref[...] * inv_m - mean * mean, 0.0)
        stats_ref[0:1, :] = mean
        stats_ref[1:2, :] = var


def _fused_linear_kernel(*refs, pre_bn, out_stats, add_res, m_real, tile_m):
    """[BN(stats)+ReLU] -> Linear (bf16 MXU) [+residual] [+batch-stat accum]."""
    it = iter(refs)
    x_ref = next(it)
    if pre_bn:
        stats_in_ref = next(it)
        gamma_ref = next(it)
        beta_ref = next(it)
    w_ref = next(it)
    b_ref = next(it)
    res_ref = next(it) if add_res else None
    y_ref = next(it)
    if out_stats:
        stats_out_ref = next(it)
        sum_sc = next(it)
        sq_sc = next(it)

    x = x_ref[...].astype(jnp.float32)
    if pre_bn:
        st = stats_in_ref[...]
        mean = st[0:1, :]
        var = st[1:2, :]
        x = (x - mean) * lax.rsqrt(var + EPS_BN)
        x = x * gamma_ref[...] + beta_ref[...]
        x = jnp.maximum(x, 0.0)  # ReLU (pyg MLP / GENConv MLP activation)

    y = jnp.dot(x.astype(jnp.bfloat16), w_ref[...],
                preferred_element_type=jnp.float32) + b_ref[...]
    if add_res:
        y = y + res_ref[...]
    y_ref[...] = y

    if out_stats:
        _stats_update(y, sum_sc, sq_sc, stats_out_ref, m_real, tile_m)


def _gen_agg_linear_kernel(*refs, has_edge, m_real, tile_m):
    """GENConv message + per-destination softmax aggregation + root add +
    first GENConv linear (bf16 MXU) + BN statistics, all fused in VMEM."""
    it = iter(refs)
    xj_ref = next(it)
    e_ref = next(it) if has_edge else None
    mask_ref = next(it)
    x_ref = next(it)
    w_ref = next(it)
    b_ref = next(it)
    y_ref = next(it)
    stats_ref = next(it)
    sum_sc = next(it)
    sq_sc = next(it)

    msg = xj_ref[...].astype(jnp.float32)                    # (T, D, C)
    if has_edge:
        msg = msg + e_ref[...].astype(jnp.float32)
    msg = jnp.maximum(msg, 0.0) + EPS_GEN                    # relu(x_j+e)+eps
    mask = mask_ref[...]                                     # (T, D, 1)
    msg = msg * mask                                         # zero padded slots

    # segment softmax over the (padded) per-destination slot axis, per channel
    seg_max = jnp.max(msg, axis=1, keepdims=True)            # (T, 1, C)
    w_soft = jnp.exp(msg - seg_max) * mask                   # (T, D, C)
    denom = jnp.sum(w_soft, axis=1, keepdims=True) + EPS_SOFTMAX
    alpha = w_soft * pl.reciprocal(denom, approx=True)
    aggr = jnp.sum(alpha * msg, axis=1)                      # (T, C)

    out = aggr + x_ref[...].astype(jnp.float32)              # GENConv root add
    y = jnp.dot(out.astype(jnp.bfloat16), w_ref[...],
                preferred_element_type=jnp.float32) + b_ref[...]
    y_ref[...] = y
    _stats_update(y, sum_sc, sq_sc, stats_ref, m_real, tile_m)


# ----------------------------- kernel wrappers -------------------------------

def fused_linear(x, w, b, *, stats_in=None, gamma=None, beta=None, res=None,
                 out_stats=False, m_real, tile_m):
    m_pad, k = x.shape
    n = w.shape[1]
    assert m_pad % tile_m == 0
    grid = (m_pad // tile_m,)
    pre_bn = stats_in is not None
    add_res = res is not None

    inputs = [x]
    in_specs = [pl.BlockSpec((tile_m, k), lambda i: (i, 0))]
    if pre_bn:
        inputs += [stats_in, gamma, beta]
        in_specs += [pl.BlockSpec((2, k), lambda i: (0, 0)),
                     pl.BlockSpec((1, k), lambda i: (0, 0)),
                     pl.BlockSpec((1, k), lambda i: (0, 0))]
    inputs += [w, b]
    in_specs += [pl.BlockSpec((k, n), lambda i: (0, 0)),
                 pl.BlockSpec((1, n), lambda i: (0, 0))]
    if add_res:
        inputs += [res]
        in_specs += [pl.BlockSpec((tile_m, n), lambda i: (i, 0))]

    out_shape = [jax.ShapeDtypeStruct((m_pad, n), jnp.float32)]
    out_specs = [pl.BlockSpec((tile_m, n), lambda i: (i, 0))]
    scratch = []
    if out_stats:
        out_shape.append(jax.ShapeDtypeStruct((2, n), jnp.float32))
        out_specs.append(pl.BlockSpec((2, n), lambda i: (0, 0)))
        scratch = [pltpu.VMEM((1, n), jnp.float32),
                   pltpu.VMEM((1, n), jnp.float32)]
        semantics = ("arbitrary",)   # stats accumulate across the row grid
    else:
        semantics = ("parallel",)    # independent row tiles (megacore-friendly)

    return pl.pallas_call(
        functools.partial(_fused_linear_kernel, pre_bn=pre_bn,
                          out_stats=out_stats, add_res=add_res,
                          m_real=m_real, tile_m=tile_m),
        out_shape=tuple(out_shape),
        grid_spec=pltpu.PrefetchScalarGridSpec(
            num_scalar_prefetch=0, grid=grid,
            in_specs=in_specs, out_specs=tuple(out_specs),
            scratch_shapes=scratch),
        compiler_params=pltpu.CompilerParams(dimension_semantics=semantics),
    )(*inputs)


def gen_agg_linear(xj3, e3, mask3, x, w, b, *, m_real, tile_m):
    n_pad, d, c = xj3.shape
    h = w.shape[1]
    assert n_pad % tile_m == 0
    grid = (n_pad // tile_m,)
    has_edge = e3 is not None

    inputs = [xj3]
    in_specs = [pl.BlockSpec((tile_m, d, c), lambda i: (i, 0, 0))]
    if has_edge:
        inputs += [e3]
        in_specs += [pl.BlockSpec((tile_m, d, c), lambda i: (i, 0, 0))]
    inputs += [mask3, x, w, b]
    in_specs += [pl.BlockSpec((tile_m, d, 1), lambda i: (i, 0, 0)),
                 pl.BlockSpec((tile_m, c), lambda i: (i, 0)),
                 pl.BlockSpec((c, h), lambda i: (0, 0)),
                 pl.BlockSpec((1, h), lambda i: (0, 0))]

    out_shape = (jax.ShapeDtypeStruct((n_pad, h), jnp.float32),
                 jax.ShapeDtypeStruct((2, h), jnp.float32))
    out_specs = (pl.BlockSpec((tile_m, h), lambda i: (i, 0)),
                 pl.BlockSpec((2, h), lambda i: (0, 0)))
    scratch = [pltpu.VMEM((1, h), jnp.float32),
               pltpu.VMEM((1, h), jnp.float32)]

    return pl.pallas_call(
        functools.partial(_gen_agg_linear_kernel, has_edge=has_edge,
                          m_real=m_real, tile_m=tile_m),
        out_shape=out_shape,
        grid_spec=pltpu.PrefetchScalarGridSpec(
            num_scalar_prefetch=0, grid=grid,
            in_specs=in_specs, out_specs=out_specs,
            scratch_shapes=scratch),
        compiler_params=pltpu.CompilerParams(
            dimension_semantics=("arbitrary",)),
    )(*inputs)


# ----------------------------- parameter init -------------------------------

def init_linear(key, fan_in, fan_out, k_pad, n_pad):
    k1, k2 = jax.random.split(key)
    bound = 1.0 / np.sqrt(fan_in)
    w = jax.random.uniform(k1, (fan_in, fan_out), jnp.float32, -bound, bound)
    b = jax.random.uniform(k2, (fan_out,), jnp.float32, -bound, bound)
    w_p = jnp.zeros((k_pad, n_pad), jnp.float32).at[:fan_in, :fan_out].set(w)
    b_p = jnp.zeros((1, n_pad), jnp.float32).at[0, :fan_out].set(b)
    return w_p.astype(jnp.bfloat16), b_p   # bf16 MXU operand, pre-cast once


def init_mlp(key, dims, dims_pad):
    """pyg MLP: Linear -> BN -> ReLU on hidden layers, plain last Linear."""
    nl = len(dims) - 1
    keys = jax.random.split(key, nl)
    ws, bs, gs, bes = [], [], [], []
    for i in range(nl):
        w, b = init_linear(keys[i], dims[i], dims[i + 1],
                           dims_pad[i], dims_pad[i + 1])
        ws.append(w)
        bs.append(b)
        if i < nl - 1:
            gs.append(jnp.ones((1, dims_pad[i + 1]), jnp.float32))
            bes.append(jnp.zeros((1, dims_pad[i + 1]), jnp.float32))
    return {"w": ws, "b": bs, "g": gs, "be": bes}


def init_genconv(key, h, h_pad, hid_pad):
    """GENConv internal MLP [h, 2h, h]: Lin -> BN -> ReLU -> Lin."""
    k1, k2 = jax.random.split(key)
    w1, b1 = init_linear(k1, h, 2 * h, h_pad, hid_pad)
    w2, b2 = init_linear(k2, 2 * h, h, hid_pad, h_pad)
    return {"w1": w1, "b1": b1,
            "g1": jnp.ones((1, hid_pad), jnp.float32),
            "be1": jnp.zeros((1, hid_pad), jnp.float32),
            "w2": w2, "b2": b2}


# ------------------------------ forward pieces -------------------------------

def mlp_forward(p, x, m_real, tile_m):
    nl = len(p["w"])
    y, stats = fused_linear(x, p["w"][0], p["b"][0],
                            out_stats=True, m_real=m_real, tile_m=tile_m)
    for i in range(1, nl - 1):
        y, stats = fused_linear(y, p["w"][i], p["b"][i],
                                stats_in=stats, gamma=p["g"][i - 1],
                                beta=p["be"][i - 1],
                                out_stats=True, m_real=m_real, tile_m=tile_m)
    (out,) = fused_linear(y, p["w"][-1], p["b"][-1],
                          stats_in=stats, gamma=p["g"][-1], beta=p["be"][-1],
                          out_stats=False, m_real=m_real, tile_m=tile_m)
    return out


def gen_conv(p, x, adj, edge_feat, m_real, tile_m):
    """GENConv with softmax aggregation (t=1, eps=1e-7) + fused residual."""
    n_pad, c = x.shape
    d = adj["deg"]
    # TODO(synk): gathers stay in JAX glue; could be moved to a Pallas DMA gather.
    xj3 = jnp.take(x, adj["src_idx"], axis=0).reshape(n_pad, d, c)
    e3 = None
    if edge_feat is not None:
        e3 = jnp.take(edge_feat, adj["eid_idx"], axis=0).reshape(n_pad, d, c)
    y, stats = gen_agg_linear(xj3, e3, adj["mask3"], x, p["w1"], p["b1"],
                              m_real=m_real, tile_m=tile_m)
    (out,) = fused_linear(y, p["w2"], p["b2"],
                          stats_in=stats, gamma=p["g1"], beta=p["be1"],
                          res=x, out_stats=False,
                          m_real=m_real, tile_m=tile_m)
    return out   # residual (x + conv) already fused in


def spcgcnet_forward(params, x_pad, e_attr_pad, node_adj, edge_adj,
                     n_real, e_real, tile_n, tile_e):
    v_x = mlp_forward(params["node_encoder"], x_pad, n_real, tile_n)
    e_x = mlp_forward(params["edge_encoder"], e_attr_pad, e_real, tile_e)
    for lp in params["layers"]:
        # TODO(synk): SPGENLayer approximated (see header comment).
        v_new = gen_conv(lp["v"], v_x, node_adj, e_x, n_real, tile_n)
        e_new = gen_conv(lp["e"], e_x, edge_adj, None, e_real, tile_e)
        v_x, e_x = v_new, e_new
    node_out = mlp_forward(params["node_decoder"], v_x, n_real, tile_n)
    edge_out = mlp_forward(params["edge_decoder"], e_x, e_real, tile_e)
    return node_out, edge_out


# ----------------------- host-side index preprocessing -----------------------

def undirected_linegraph_index_np(edge_index, num_nodes):
    """Replicates undirected_linegraph_index for an already-coalesced edge_index."""
    row, col = edge_index
    E = row.shape[0]
    count = np.bincount(row, minlength=num_nodes)
    cumsum = np.concatenate([[0], np.cumsum(count)])
    rows, cols = [], []
    for j in range(E):
        c = np.arange(cumsum[col[j]], cumsum[col[j] + 1], dtype=np.int64)
        rows.append(np.full_like(c, j))
        cols.append(c)
    return np.stack([np.concatenate(rows), np.concatenate(cols)], axis=0)


def build_padded_adjacency(src, dst, num_dst, num_dst_pad):
    """Per-destination padded slot layout (replaces the dense one-hot scatter)."""
    src = np.asarray(src)
    dst = np.asarray(dst)
    E = src.shape[0]
    deg = np.bincount(dst, minlength=num_dst) if E > 0 else np.zeros(num_dst, np.int64)
    d = _round_up(int(max(deg.max() if E > 0 else 1, 1)), 8)
    src_idx = np.zeros((num_dst_pad, d), np.int32)
    eid_idx = np.zeros((num_dst_pad, d), np.int32)
    mask = np.zeros((num_dst_pad, d), np.float32)
    fill = np.zeros(num_dst, np.int64)
    for e in range(E):
        t = int(dst[e])
        s = int(fill[t])
        src_idx[t, s] = int(src[e])
        eid_idx[t, s] = e
        mask[t, s] = 1.0
        fill[t] += 1
    return {"src_idx": jnp.asarray(src_idx.reshape(-1)),
            "eid_idx": jnp.asarray(eid_idx.reshape(-1)),
            "mask3": jnp.asarray(mask[..., None]),
            "deg": d}


# ----------------------------------- main ------------------------------------

if __name__ == "__main__":
    # hyper-parameters (small, consistent with the module signature)
    N = 16
    node_in, edge_in = 4, 4
    mlp_hidden, mlp_hidden_layers = 32, 2
    gcn_hidden, gcn_num_layers = 32, 3
    node_out_c, edge_out_c = 2, 2

    # lane-aligned (128) channel widths
    IN_P = LANE
    HID_P = _round_up(mlp_hidden, LANE)
    GCN_P = _round_up(gcn_hidden, LANE)
    GEN_HID_P = _round_up(2 * gcn_hidden, LANE)
    OUT_P = LANE

    # build a small undirected graph (ring + chords), already coalesced
    pairs = [(i, (i + 1) % N) for i in range(N)] + \
            [(i, (i + 5) % N) for i in range(0, N, 4)]
    directed = set()
    for a, b in pairs:
        directed.add((a, b))
        directed.add((b, a))
    edges = sorted(directed)                       # lexicographic == coalesce order
    edge_index_np = np.array(edges, dtype=np.int64).T            # [2, E]
    E = edge_index_np.shape[1]
    e_edge_index_np = undirected_linegraph_index_np(edge_index_np, N)

    N_pad, tile_n = _pad_rows(N)
    E_pad, tile_e = _pad_rows(E)

    node_adj = build_padded_adjacency(edge_index_np[0], edge_index_np[1], N, N_pad)
    edge_adj = build_padded_adjacency(e_edge_index_np[0], e_edge_index_np[1], E, E_pad)

    key = jax.random.PRNGKey(0)
    kx, ke, kp = jax.random.split(key, 3)
    x = jax.random.normal(kx, (N, node_in), jnp.float32)
    edge_attr = jax.random.normal(ke, (E, edge_in), jnp.float32)
    x_pad = jnp.zeros((N_pad, IN_P), jnp.float32).at[:N, :node_in].set(x)
    e_attr_pad = jnp.zeros((E_pad, IN_P), jnp.float32).at[:E, :edge_in].set(edge_attr)

    # parameters (deterministic, pre-padded / pre-cast once)
    n_mlp = mlp_hidden_layers + 1   # num_layers in each pyg MLP

    def enc_dims(cin, cout):
        return [cin] + [mlp_hidden] * (n_mlp - 1) + [cout]

    def enc_dims_pad(cin_p, cout_p):
        return [cin_p] + [HID_P] * (n_mlp - 1) + [cout_p]

    kks = jax.random.split(kp, 4 + gcn_num_layers * 2)
    params = {
        "node_encoder": init_mlp(kks[0], enc_dims(node_in, gcn_hidden),
                                 enc_dims_pad(IN_P, GCN_P)),
        "edge_encoder": init_mlp(kks[1], enc_dims(edge_in, gcn_hidden),
                                 enc_dims_pad(IN_P, GCN_P)),
        "node_decoder": init_mlp(kks[2], enc_dims(gcn_hidden, node_out_c),
                                 enc_dims_pad(GCN_P, OUT_P)),
        "edge_decoder": init_mlp(kks[3], enc_dims(gcn_hidden, edge_out_c),
                                 enc_dims_pad(GCN_P, OUT_P)),
        "layers": [
            {"v": init_genconv(kks[4 + 2 * i], gcn_hidden, GCN_P, GEN_HID_P),
             "e": init_genconv(kks[5 + 2 * i], gcn_hidden, GCN_P, GEN_HID_P)}
            for i in range(gcn_num_layers)
        ],
    }

    node_out_pad, edge_out_pad = spcgcnet_forward(
        params, x_pad, e_attr_pad, node_adj, edge_adj, N, E, tile_n, tile_e)
    node_out = node_out_pad[:N, :node_out_c]
    edge_out = edge_out_pad[:E, :edge_out_c]
    jax.block_until_ready((node_out, edge_out))

    assert node_out.shape == (N, node_out_c) and edge_out.shape == (E, edge_out_c)
    assert bool(jnp.all(jnp.isfinite(node_out))) and bool(jnp.all(jnp.isfinite(edge_out)))
    print("KERNEL_OK")
</pallas_src>

<mosaic_0001>
module attributes {stable_mosaic.version = 11 : i64} {
  func.func @_fused_linear_kernel(%arg0: i32, %arg1: memref<16x128xf32, #tpu.memory_space<vmem>>, %arg2: memref<128x128xbf16, #tpu.memory_space<vmem>>, %arg3: memref<1x128xf32, #tpu.memory_space<vmem>>, %arg4: memref<16x128xf32, #tpu.memory_space<vmem>>, %arg5: memref<2x128xf32, #tpu.memory_space<vmem>>, %arg6: memref<1x128xf32, #tpu.memory_space<vmem>>, %arg7: memref<1x128xf32, #tpu.memory_space<vmem>>) attributes {dimension_semantics = [#tpu.dimension_semantics<arbitrary>], iteration_bounds = array<i64: 1>, scalar_prefetch = 0 : i64, scratch_operands = 2 : i64, tpu.core_type = #tpu.core_type<tc>, window_params = [{transform_indices = @transform_0, window_bounds = array<i64: 16, 128>}, {pipeline_mode = #tpu.pipeline_mode<synchronous>, transform_indices = @transform_1, window_bounds = array<i64: 128, 128>}, {pipeline_mode = #tpu.pipeline_mode<synchronous>, transform_indices = @transform_2, window_bounds = array<i64: 1, 128>}, {transform_indices = @transform_3, window_bounds = array<i64: 16, 128>}, {pipeline_mode = #tpu.pipeline_mode<synchronous>, transform_indices = @transform_4, window_bounds = array<i64: 2, 128>}]} {
    %c0 = arith.constant 0 : index
    %c0_0 = arith.constant 0 : index
    %0 = vector.load %arg1[%c0, %c0_0] : memref<16x128xf32, #tpu.memory_space<vmem>>, vector<16x128xf32>
    %1 = arith.truncf %0 : vector<16x128xf32> to vector<16x128xbf16>
    %c0_1 = arith.constant 0 : index
    %c0_2 = arith.constant 0 : index
    %2 = vector.load %arg2[%c0_1, %c0_2] : memref<128x128xbf16, #tpu.memory_space<vmem>>, vector<128x128xbf16>
    %cst = arith.constant dense<0.000000e+00> : vector<16x128xf32>
    %3 = tpu.matmul %1, %2, %cst {dimension_numbers = #tpu.dot_dimension_numbers<[1], [0], [0], [1], [0, 0, 1, 1], [], []>} : vector<16x128xbf16>, vector<128x128xbf16>, vector<16x128xf32> -> vector<16x128xf32>
    %c0_3 = arith.constant 0 : index
    %c0_4 = arith.constant 0 : index
    %4 = vector.load %arg3[%c0_3, %c0_4] : memref<1x128xf32, #tpu.memory_space<vmem>>, vector<1x128xf32>
    %5 = vector.broadcast %4 : vector<1x128xf32> to vector<16x128xf32>
    %6 = arith.addf %3, %5 : vector<16x128xf32>
    %c0_5 = arith.constant 0 : index
    %c0_6 = arith.constant 0 : index
    %7 = vector.load %arg4[%c0_5, %c0_6] : memref<16x128xf32, #tpu.memory_space<vmem>>, vector<16x128xf32>
    tpu.vector_store %arg4[%c0_5, %c0_6], %6 {strides = array<i32>} : memref<16x128xf32, #tpu.memory_space<vmem>>, vector<16x128xf32>,
    %c0_i32 = arith.constant 0 : i32
    %8 = arith.cmpi eq, %arg0, %c0_i32 : i32
    %9 = arith.extui %8 : i1 to i32
    %c0_i32_7 = arith.constant 0 : i32
    %10 = arith.cmpi ne, %9, %c0_i32_7 : i32
    scf.if %10 {
      %cst_21 = arith.constant 0.000000e+00 : f32
      %34 = vector.broadcast %cst_21 : f32 to vector<1x128xf32>
      %c0_22 = arith.constant 0 : index
      %c0_23 = arith.constant 0 : index
      %35 = vector.load %arg6[%c0_22, %c0_23] : memref<1x128xf32, #tpu.memory_space<vmem>>, vector<1x128xf32>
      tpu.vector_store %arg6[%c0_22, %c0_23], %34 {strides = array<i32>} : memref<1x128xf32, #tpu.memory_space<vmem>>, vector<1x128xf32>,
      %cst_24 = arith.constant 0.000000e+00 : f32
      %36 = vector.broadcast %cst_24 : f32 to vector<1x128xf32>
      %c0_25 = arith.constant 0 : index
      %c0_26 = arith.constant 0 : index
      %37 = vector.load %arg7[%c0_25, %c0_26] : memref<1x128xf32, #tpu.memory_space<vmem>>, vector<1x128xf32>
      tpu.vector_store %arg7[%c0_25, %c0_26], %36 {strides = array<i32>} : memref<1x128xf32, #tpu.memory_space<vmem>>, vector<1x128xf32>,
    } else {
    }
    %c16_i32 = arith.constant 16 : i32
    %11 = arith.muli %arg0, %c16_i32 : i32
    %12 = tpu.iota {dimensions = array<i32: 0>} : vector<16x128xi32>
    %13 = vector.broadcast %11 : i32 to vector<16x128xi32>
    %14 = arith.addi %13, %12 : vector<16x128xi32>
    %c16_i32_8 = arith.constant 16 : i32
    %15 = vector.broadcast %c16_i32_8 : i32 to vector<16x128xi32>
    %16 = arith.cmpi slt, %14, %15 : vector<16x128xi32>
    %17 = arith.extui %16 : vector<16x128xi1> to vector<16x128xi32>
    %18 = arith.sitofp %17 : vector<16x128xi32> to vector<16x128xf32>
    %19 = arith.mulf %6, %18 : vector<16x128xf32>
    %c0_9 = arith.constant 0 : index
    %c0_10 = arith.constant 0 : index
    %20 = vector.load %arg6[%c0_9, %c0_10] : memref<1x128xf32, #tpu.memory_space<vmem>>, vector<1x128xf32>
    %cst_11 = arith.constant dense<0.000000e+00> : vector<128xf32>
    %21 = vector.multi_reduction <add>, %19, %cst_11 [0] : vector<16x128xf32> to vector<128xf32>
    %22 = vector.shape_cast %21 : vector<128xf32> to vector<1x128xf32>
    %23 = arith.addf %20, %22 : vector<1x128xf32>
    %c0_12 = arith.constant 0 : index
    %c0_13 = arith.constant 0 : index
    %24 = vector.load %arg6[%c0_12, %c0_13] : memref<1x128xf32, #tpu.memory_space<vmem>>, vector<1x128xf32>
    tpu.vector_store %arg6[%c0_12, %c0_13], %23 {strides = array<i32>} : memref<1x128xf32, #tpu.memory_space<vmem>>, vector<1x128xf32>,
    %c0_14 = arith.constant 0 : index
    %c0_15 = arith.constant 0 : index
    %25 = vector.load %arg7[%c0_14, %c0_15] : memref<1x128xf32, #tpu.memory_space<vmem>>, vector<1x128xf32>
    %26 = arith.mulf %19, %6 : vector<16x128xf32>
    %cst_16 = arith.constant dense<0.000000e+00> : vector<128xf32>
    %27 = vector.multi_reduction <add>, %26, %cst_16 [0] : vector<16x128xf32> to vector<128xf32>
    %28 = vector.shape_cast %27 : vector<128xf32> to vector<1x128xf32>
    %29 = arith.addf %25, %28 : vector<1x128xf32>
    %c0_17 = arith.constant 0 : index
    %c0_18 = arith.constant 0 : index
    %30 = vector.load %arg7[%c0_17, %c0_18] : memref<1x128xf32, #tpu.memory_space<vmem>>, vector<1x128xf32>
    tpu.vector_store %arg7[%c0_17, %c0_18], %29 {strides = array<i32>} : memref<1x128xf32, #tpu.memory_space<vmem>>, vector<1x128xf32>,
    %c0_i32_19 = arith.constant 0 : i32
    %31 = arith.cmpi eq, %arg0, %c0_i32_19 : i32
    %32 = arith.extui %31 : i1 to i32
    %c0_i32_20 = arith.constant 0 : i32
    %33 = arith.cmpi ne, %32, %c0_i32_20 : i32
    scf.if %33 {
      %c0_21 = arith.constant 0 : index
      %c0_22 = arith.constant 0 : index
      %34 = vector.load %arg6[%c0_21, %c0_22] : memref<1x128xf32, #tpu.memory_space<vmem>>, vector<1x128xf32>
      %cst_23 = arith.constant 6.250000e-02 : f32
      %35 = vector.broadcast %cst_23 : f32 to vector<1x128xf32>
      %36 = arith.mulf %34, %35 : vector<1x128xf32>
      %c0_24 = arith.constant 0 : index
      %c0_25 = arith.constant 0 : index
      %37 = vector.load %arg7[%c0_24, %c0_25] : memref<1x128xf32, #tpu.memory_space<vmem>>, vector<1x128xf32>
      %cst_26 = arith.constant 6.250000e-02 : f32
      %38 = vector.broadcast %cst_26 : f32 to vector<1x128xf32>
      %39 = arith.mulf %37, %38 : vector<1x128xf32>
      %40 = arith.mulf %36, %36 : vector<1x128xf32>
      %41 = arith.subf %39, %40 : vector<1x128xf32>
      %cst_27 = arith.constant 0.000000e+00 : f32
      %42 = vector.broadcast %cst_27 : f32 to vector<1x128xf32>
      %43 = arith.maximumf %41, %42 : vector<1x128xf32>
      %c0_28 = arith.constant 0 : index
      %c0_29 = arith.constant 0 : index
      %44 = vector.load %arg5[%c0_28, %c0_29] : memref<2x128xf32, #tpu.memory_space<vmem>>, vector<1x128xf32>
      tpu.vector_store %arg5[%c0_28, %c0_29], %36 {strides = array<i32>} : memref<2x128xf32, #tpu.memory_space<vmem>>, vector<1x128xf32>,
      %c1 = arith.constant 1 : index
      %c0_30 = arith.constant 0 : index
      %45 = vector.load %arg5[%c1, %c0_30] : memref<2x128xf32, #tpu.memory_space<vmem>>, vector<1x128xf32>
      tpu.vector_store %arg5[%c1, %c0_30], %43 {strides = array<i32>} : memref<2x128xf32, #tpu.memory_space<vmem>>, vector<1x128xf32>,
    } else {
    }
    return
  }
  func.func @transform_0(%arg0: i32) -> (i32, i32) {
    %c0_i32 = arith.constant 0 : i32
    %c0_i32_0 = arith.constant 0 : i32
    return %arg0, %c0_i32 : i32, i32
  }
  func.func @transform_1(%arg0: i32) -> (i32, i32) {
    %c0_i32 = arith.constant 0 : i32
    %c0_i32_0 = arith.constant 0 : i32
    %c0_i32_1 = arith.constant 0 : i32
    return %c0_i32, %c0_i32_0 : i32, i32
  }
  func.func @transform_2(%arg0: i32) -> (i32, i32) {
    %c0_i32 = arith.constant 0 : i32
    %c0_i32_0 = arith.constant 0 : i32
    %c0_i32_1 = arith.constant 0 : i32
    return %c0_i32, %c0_i32_0 : i32, i32
  }
  func.func @transform_3(%arg0: i32) -> (i32, i32) {
    %c0_i32 = arith.constant 0 : i32
    %c0_i32_0 = arith.constant 0 : i32
    return %arg0, %c0_i32 : i32, i32
  }
  func.func @transform_4(%arg0: i32) -> (i32, i32) {
    %c0_i32 = arith.constant 0 : i32
    %c0_i32_0 = arith.constant 0 : i32
    %c0_i32_1 = arith.constant 0 : i32
    return %c0_i32, %c0_i32_0 : i32, i32
  }
}

</mosaic_0001>

<bundles_post_ra>
// kernel: tpu_custom_call.1
= control target key start
LH: loop header
LB: loop body
LE: loop exit
PB: predicated region body
PF: predicated region fallthrough
CT: control target
= control target key end

     0   :  { %10 = vsyncpa [#allocation5], 0  ;;  %s495_s0 = inlined_call_operand.hbm [shape: f32[16,128], index: 0, kind: input, shape index: {}]   ;;  %s496_s1 = inlined_call_operand.hbm [shape: bf16[128,128], index: 1, kind: input, shape index: {}]   ;;  %s497_s2 = inlined_call_operand.vmem [shape: f32[1,128], index: 2, kind: input, shape index: {}]   ;;  %s498_s3 = inlined_call_operand.hbm [shape: f32[16,128], index: 3, kind: output, shape index: {0}]   ;;  %s499_s4 = inlined_call_operand.hbm [shape: f32[2,128], index: 4, kind: output, shape index: {1}]  }
   0x1   :  { %11 = vsyncpa [#allocation8], 0 }
   0x2   :  { %12 = vsyncpa [#allocation6], 0 }
   0x3   :  { %13 = vsyncpa [#allocation11], 0  ;;  %s403_s15 = smov [#allocation4]   ;;  %s307_s19 = scalar_lea.hbm %s495_s0, 256 }
   0x4   :  { %s19_s16 = sshll.u32 %s403_s15, 4  ;;  %p308_p0 = scmp.ne.s32.totalorder %s495_s0, %s307_s19  ;;  %s20_s16 = int_to_ptr.vmem [resolvable:$true] %s19_s16 }
   0x5   :  { %p311_p1 = scmp.lt.u32.totalorder %s307_s19, %s495_s0 }
   0x7   :  { %p313_p2 = pnand %p311_p1, %p308_p0 }
   0x9   :  { %316 = shalt.err (!%p313_p2)
}
   0xa   :  { %s317_s24 = scalar_lea.vmem %s20_s16, 256  ;;  %p322_p4 = scmp.lt.s32.totalorder %s20_s16, %s20_s16 }
   0xb   :  { %p318_p3 = scmp.ne.s32.totalorder %s20_s16, %s317_s24  ;;  %p323_p5 = scmp.lt.s32.totalorder %s317_s24, %s317_s24 }
   0xd   :  { %p324_p6 = por %p323_p5, %p322_p4 }
   0xf   :  { %p325_p7 = pnand %p324_p6, %p318_p3 }
  0x11   :  { %328 = shalt.err (!%p325_p7)
}
  0x12   :  { %s404_s25 = smov 128   ;;  %s405_s26 = smov 8  }
  0x13   :  { %25 = dma.hbm_to_vmem [thread:$0]  %s495_s0, 256, %s20_s16, [#allocation5], %s404_s25, %s404_s25, %s405_s26  }
  0x14   :  { %s406_s29 = smov [#allocation7]   ;;  %s329_s7 = scalar_lea.hbm %s496_s1, 1024 }
  0x15   :  { %s31_s30 = sshll.u32 %s406_s29, 4  ;;  %p330_p8 = scmp.ne.s32.totalorder %s496_s1, %s329_s7  ;;  %s32_s30 = int_to_ptr.vmem [resolvable:$true] %s31_s30 }
  0x16   :  { %p333_p9 = scmp.lt.u32.totalorder %s329_s7, %s496_s1 }
  0x18   :  { %p335_p10 = pnand %p333_p9, %p330_p8 }
  0x1a   :  { %338 = shalt.err (!%p335_p10)
}
  0x1b   :  { %s339_s12 = scalar_lea.vmem %s32_s30, 1024  ;;  %p344_p12 = scmp.lt.s32.totalorder %s32_s30, %s32_s30 }
  0x1c   :  { %p340_p11 = scmp.ne.s32.totalorder %s32_s30, %s339_s12  ;;  %p345_p13 = scmp.lt.s32.totalorder %s339_s12, %s339_s12 }
  0x1e   :  { %p346_p0 = por %p345_p13, %p344_p12 }
  0x20   :  { %p347_p1 = pnand %p346_p0, %p340_p11 }
  0x22   :  { %350 = shalt.err (!%p347_p1)
}
  0x23   :  { %s407_s0 = smov 64   ;;  %s408_s13 = smov 4  }
  0x24   :  { %37 = dma.hbm_to_vmem [thread:$0]  %s496_s1, 1024, %s32_s30, [#allocation8], %s407_s0, %s407_s0, %s408_s13  }
  0x25   :  { %395 = dma.done.wait [#allocation5], 256  }
  0x26   :  { %396 = vsyncadd [#allocation5], 4294967040 }
  0x27   :  { %397 = dma.done.wait [#allocation8], 1024  }
  0x28   :  { %398 = vsyncadd [#allocation8], 4294966272  ;;  %v409_v0 = vmov 0.0   ;;  %vm410_vm0 = vmmov 0   ;;  %v299_v1 = vld [vmem:[#allocation7] sm:$0xff]   ;;  %v300_v2 = vld [vmem:[#allocation7 + $0x8] sm:$0xff]  }
  0x29   :  { %269 = vmatprep.subr.bf16.mxu0 %v409_v0  ;;  %168 = vst [vmem:[#allocation2] sm:$0x1] %v409_v0  ;;  %169 = vst [vmem:[#allocation3] sm:$0x1] %v409_v0  ;;  %285 = vmatprep.mubr.msk.bf16.mxu0 %vm410_vm0, %v409_v0  ;;  %v301_v3 = vld [vmem:[#allocation7 + $0x10] sm:$0xff]   ;;  %v302_v4 = vld [vmem:[#allocation7 + $0x18] sm:$0xff]  }
  0x2a   :  { %270 = vmatpush3.bf16.msra.mxu0 %v299_v1  ;;  %v303_v5 = vld [vmem:[#allocation7 + $0x20] sm:$0xff]   ;;  %v304_v6 = vld [vmem:[#allocation7 + $0x28] sm:$0xff]   ;;  %v305_v7 = vld [vmem:[#allocation7 + $0x30] sm:$0xff]   ;;  %s411_s17 = smov [#allocation9]  }
  0x2b   :  { %271 = vmatprep.subr.bf16.mxu0 %v409_v0  ;;  %v306_v8 = vld [vmem:[#allocation7 + $0x38] sm:$0xff]   ;;  %v47_v9 = vld [vmem:[#allocation4] sm:$0xff]  ;;  %v251_v12 = vld [vmem:[%s497_s2] ss:$0 sm:$0xff]  ;;  %s224_s18 = sshll.u32 %s411_s17, 4  ;;  %s225_s18 = int_to_ptr.vmem [resolvable:$true] %s224_s18 }
  0x2c   :  { %v48_v10 = vld [vmem:[#allocation4 + $0x8] sm:$0xff]  ;;  %s351_s19 = scalar_lea.vmem %s225_s18, 256  ;;  %p356_p3 = scmp.lt.s32.totalorder %s225_s18, %s225_s18 }
  0x2d   :  { %v49_v11 = vpack.c.bf16 %v48_v10, %v47_v9  ;;  %p352_p2 = scmp.ne.s32.totalorder %s225_s18, %s351_s19  ;;  %p357_p4 = scmp.lt.s32.totalorder %s351_s19, %s351_s19 }
  0x2e   :  { %272 = vmatpush3.bf16.msra.mxu0 %v300_v2 }
  0x2f   :  { %273 = vmatprep.subr.bf16.mxu0 %v409_v0  ;;  %p358_p5 = por %p357_p4, %p356_p3 }
  0x31   :  { %p359_p6 = pnand %p358_p5, %p352_p2 }
  0x32   :  { %274 = vmatpush3.bf16.msra.mxu0 %v301_v3 }
  0x33   :  { %275 = vmatprep.subr.bf16.mxu0 %v409_v0 }
  0x36   :  { %276 = vmatpush3.bf16.msra.mxu0 %v302_v4 }
  0x37   :  { %277 = vmatprep.subr.bf16.mxu0 %v409_v0 }
  0x3a   :  { %278 = vmatpush3.bf16.msra.mxu0 %v303_v5 }
  0x3b   :  { %279 = vmatprep.subr.bf16.mxu0 %v409_v0 }
  0x3e   :  { %280 = vmatpush3.bf16.msra.mxu0 %v304_v6 }
  0x3f   :  { %281 = vmatprep.subr.bf16.mxu0 %v409_v0 }
  0x42   :  { %282 = vmatpush3.bf16.msra.mxu0 %v305_v7 }
  0x43   :  { %283 = vmatprep.subr.bf16.mxu0 %v409_v0 }
  0x46   :  { %284 = vmatpush3.bf16.msra.mxu0 %v306_v8 }
  0x49   :  { %286 = vmatmul.mubr.bf16.vlgmr.msra.gmra.mrb[0].mxu0 %v49_v11 }
 0x11c   :  { %v155_v13 = vpop.f32.mrb[0].mxu0 }
 0x11d   :  { %v156_v14 = vadd.f32 %v251_v12, %v155_v13  ;;  %v287_v15 = vpop.f32.mrb[1].mxu0 }
 0x11e   :  { %v158_v16 = vpop.f32.mrb[2].mxu0 }
 0x11f   :  { %162 = vst [vmem:[#allocation9] sm:$0xff] %v156_v14  ;;  %v159_v17 = vadd.f32 %v251_v12, %v158_v16  ;;  %v288_v18 = vpop.f32.mrb[3].mxu0  ;;  %v196_v19 = vmul.f32 %v156_v14, %v156_v14 }
 0x121   :  { %v186_v20 = vadd.f32 %v159_v17, %v156_v14  ;;  %v197_v21 = vmul.f32 %v159_v17, %v159_v17  ;;  %163 = vst [vmem:[#allocation9 + $0x8] sm:$0xff] %v159_v17 }
 0x122   :  { %362 = shalt.err (!%p359_p6)
}
 0x123   :  { %s363_s21 = scalar_lea.hbm %s498_s3, 256 }
 0x124   :  { %p364_p7 = scmp.ne.s32.totalorder %s498_s3, %s363_s21  ;;  %p367_p8 = scmp.lt.u32.totalorder %s363_s21, %s498_s3 }
 0x126   :  { %p369_p9 = pnand %p367_p8, %p364_p7 }
 0x128   :  { %372 = shalt.err (!%p369_p9)
}
 0x129   :  { %230 = dma.vmem_to_hbm [thread:$0]  %s225_s18, 256, %s498_s3, [#allocation6], %s404_s25, %s404_s25, %s405_s26   ;;  %v187_v22 = vrot.slane %v186_v20, 4  ;;  %v198_v23 = vadd.f32 %v197_v21, %v196_v19  ;;  %v185_v32 = vld [vmem:[#allocation2] sm:$0x1] }
 0x12a   :  { %v195_v35 = vld [vmem:[#allocation3] sm:$0x1]  ;;  %s412_s3 = smov [#allocation10]  }
 0x12b   :  { %v188_v24 = vadd.f32 %v187_v22, %v186_v20  ;;  %v199_v25 = vrot.slane %v198_v23, 4  ;;  %s237_s25 = sshll.u32 %s412_s3, 4  ;;  %s238_s25 = int_to_ptr.vmem [resolvable:$true] %s237_s25 }
 0x12c   :  { %s373_s26 = scalar_lea.vmem %s238_s25, 32  ;;  %p378_p11 = scmp.lt.s32.totalorder %s238_s25, %s238_s25 }
 0x12d   :  { %v189_v26 = vrot.slane %v188_v24, 2  ;;  %v200_v27 = vadd.f32 %v199_v25, %v198_v23  ;;  %p374_p10 = scmp.ne.s32.totalorder %s238_s25, %s373_s26  ;;  %p379_p12 = scmp.lt.s32.totalorder %s373_s26, %s373_s26 }
 0x12f   :  { %v190_v28 = vadd.f32 %v189_v26, %v188_v24  ;;  %v201_v29 = vrot.slane %v200_v27, 2  ;;  %p380_p13 = por %p379_p12, %p378_p11 }
 0x131   :  { %v191_v30 = vrot.slane %v190_v28, 1  ;;  %v202_v31 = vadd.f32 %v201_v29, %v200_v27  ;;  %p381_p0 = pnand %p380_p13, %p374_p10 }
 0x133   :  { %v192_v33 = vadd.f32 %v191_v30, %v190_v28  ;;  %v203_v34 = vrot.slane %v202_v31, 1 }
 0x135   :  { %v193_v36 = vadd.f32 %v192_v33, %v185_v32  ;;  %v204_v37 = vadd.f32 %v203_v34, %v202_v31 }
 0x137   :  { %194 = vst [vmem:[#allocation2] sm:$0x1] %v193_v36  ;;  %v205_v38 = vadd.f32 %v204_v37, %v195_v35 }
 0x139   :  { %206 = vst [vmem:[#allocation3] sm:$0x1] %v205_v38 }
 0x13e   :  { %v210_v39 = vld [vmem:[#allocation2] sm:$0x1] }
 0x13f   :  { %v211_v40 = vmul.f32 0.0625, %v210_v39 }
 0x140   :  { %v212_v41 = vld [vmem:[#allocation3] sm:$0x1] }
 0x141   :  { %v213_v42 = vmul.f32 0.0625, %v212_v41  ;;  %v214_v43 = vmul.f32 %v211_v40, %v211_v40  ;;  %217 = vst [vmem:[#allocation10] sm:$0x1] %v211_v40 }
 0x143   :  { %v215_v44 = vsub.f32 %v213_v42, %v214_v43 }
 0x145   :  { %v216_v45 = vmax.f32 %v215_v44, 0.0 }
 0x147   :  { %218 = vst [vmem:[#allocation10 + $0x1] sm:$0x1] %v216_v45 }
 0x148   :  { %384 = shalt.err (!%p381_p0)
}
 0x149   :  { %s385_s6 = scalar_lea.hbm %s499_s4, 32 }
 0x14a   :  { %p386_p1 = scmp.ne.s32.totalorder %s499_s4, %s385_s6  ;;  %p389_p2 = scmp.lt.u32.totalorder %s385_s6, %s499_s4 }
 0x14c   :  { %p391_p3 = pnand %p389_p2, %p386_p1 }
 0x14e   :  { %394 = shalt.err (!%p391_p3)
}
 0x14f   :  { %240 = dma.vmem_to_hbm [thread:$0]  %s238_s25, 32, %s499_s4, [#allocation11]  }
 0x150   :  { %399 = dma.done.wait [#allocation6], 256  }
 0x151   :  { %400 = vsyncadd [#allocation6], 4294967040 }
 0x152   :  { %401 = dma.done.wait [#allocation11], 32  }
 0x153   :  { %402 = vsyncadd [#allocation11], 4294967264 }
 0x154   :  { %247 = vsyncpa [#allocation5], 1 }
 0x155   :  { %248 = vsyncpa [#allocation8], 1 }
 0x156   :  { %249 = vsyncpa [#allocation6], 1 }
 0x157   :  { %250 = vsyncpa [#allocation11], 1 }

</bundles_post_ra>
